<compile_context>
chip_gen: v5e
topology: v5e:2x2
jax: 0.10.0
libtpu: 0.0.40
codegen_flags: <defaults>
</compile_context>

<pallas_src>
import jax
import jax.numpy as jnp
from jax.experimental import pallas as pl
from jax.experimental.pallas import tpu as pltpu

# ----------------------------- problem sizes -----------------------------
D_IN  = 2          # input coordinate dim
NFEAT = 16         # Fourier features -> rff output dim = 2*NFEAT
SCALE = 10.0       # Fourier scale
H     = 32         # hidden width; dim_layers = [2*NFEAT, H, H, H, 1]
D_OUT = 1
N     = 256        # batch (lane axis inside the kernel)


def mlphard_kernel(x_ref, wr_ref,
                   w1s_ref, w1c_ref, b1_ref,
                   w2_ref, b2_ref,
                   w3_ref, b3_ref,
                   w4_ref, b4_ref,
                   o_ref):
    # Feature-major: every activation is (feat, N) with N on the lane axis.
    x = x_ref[...]                                           # (D_IN, N)

    # Fourier projection as a VPU outer product (no K=2 MXU matmul).
    # wr_ref holds (2*pi*Wr).T, shape (NFEAT, D_IN); 2*pi folded at init.
    proj = wr_ref[:, 0:1] * x[0:1, :]                        # (NFEAT, N)
    for d in range(1, D_IN):                                 # static unroll
        proj = proj + wr_ref[:, d:d + 1] * x[d:d + 1, :]

    sin_p = jnp.sin(proj)                                    # (NFEAT, N)
    cos_p = jnp.cos(proj)                                    # (NFEAT, N)

    # Layer 1: W1 pre-split into sin/cos halves -> no lane-axis concatenate.
    a1 = jnp.tanh(
        jnp.dot(w1s_ref[...], sin_p, preferred_element_type=jnp.float32)
        + jnp.dot(w1c_ref[...], cos_p, preferred_element_type=jnp.float32)
        + b1_ref[...])                                       # (H, N)

    a2 = jnp.tanh(jnp.dot(w2_ref[...], a1,
                          preferred_element_type=jnp.float32) + b2_ref[...])
    a3 = jnp.tanh(jnp.dot(w3_ref[...], a2,
                          preferred_element_type=jnp.float32) + b3_ref[...])

    logits = jnp.dot(w4_ref[...], a3,
                     preferred_element_type=jnp.float32) + b4_ref[...]
    o_ref[...] = jax.nn.sigmoid(logits).astype(o_ref.dtype)  # (D_OUT, N), lane-dense


def mlphard_forward(x, kernel_params):
    """x: (N, D_IN) float32. Returns (N, D_OUT) float32."""
    n = x.shape[0]
    x_t = x.T  # (D_IN, N) -- layout plumbing outside the kernel

    vmem = pl.BlockSpec(memory_space=pltpu.MemorySpace.VMEM)
    out_t = pl.pallas_call(
        mlphard_kernel,
        out_shape=jax.ShapeDtypeStruct((D_OUT, n), jnp.float32),
        in_specs=[vmem] * (1 + len(kernel_params)),
        out_specs=vmem,
    )(x_t, *kernel_params)
    # (1, N) -> (N, 1): pure reshape, same row-major element order.
    return out_t.reshape(n, D_OUT)


# ----------------------------- parameters -----------------------------
def init_params(key):
    """Parameters in the PyTorch module's native orientation.

    Fourier.b : (D_IN, NFEAT) = randn * scale
    Linear l  : weight (out, in), bias (out,)
    """
    ks = jax.random.split(key, 9)
    wr = jax.random.normal(ks[0], (D_IN, NFEAT), jnp.float32) * SCALE

    def linear(kw, kb, d_in, d_out):
        bound = 1.0 / jnp.sqrt(jnp.float32(d_in))
        w = jax.random.uniform(kw, (d_out, d_in), jnp.float32, -bound, bound)
        b = jax.random.uniform(kb, (d_out,), jnp.float32, -bound, bound)
        return w, b

    w1, b1 = linear(ks[1], ks[2], 2 * NFEAT, H)
    w2, b2 = linear(ks[3], ks[4], H, H)
    w3, b3 = linear(ks[5], ks[6], H, H)
    w4, b4 = linear(ks[7], ks[8], H, D_OUT)
    return dict(wr=wr, w1=w1, b1=b1, w2=w2, b2=b2, w3=w3, b3=b3, w4=w4, b4=b4)


def pack_kernel_params(p):
    """Repack into the kernel's feature-major layout (one-time, at init)."""
    two_pi = jnp.float32(2.0 * jnp.pi)
    wr_t = (two_pi * p["wr"]).T              # (NFEAT, D_IN), 2*pi folded in
    w1_sin = p["w1"][:, :NFEAT]              # (H, NFEAT) -- sin half of W1
    w1_cos = p["w1"][:, NFEAT:]              # (H, NFEAT) -- cos half of W1
    b1 = p["b1"].reshape(H, 1)
    b2 = p["b2"].reshape(H, 1)
    b3 = p["b3"].reshape(H, 1)
    b4 = p["b4"].reshape(D_OUT, 1)
    return (wr_t, w1_sin, w1_cos, b1,
            p["w2"], b2, p["w3"], b3, p["w4"], b4)


# ----------------------------- reference -----------------------------
def mlphard_reference(x, p):
    """Faithful batch-major re-implementation of the PyTorch forward."""
    proj = 2.0 * jnp.pi * (x @ p["wr"])
    ar = jnp.concatenate([jnp.sin(proj), jnp.cos(proj)], axis=-1)
    a1 = jnp.tanh(ar @ p["w1"].T + p["b1"])
    a2 = jnp.tanh(a1 @ p["w2"].T + p["b2"])
    a3 = jnp.tanh(a2 @ p["w3"].T + p["b3"])
    return jax.nn.sigmoid(a3 @ p["w4"].T + p["b4"])


if __name__ == "__main__":
    key = jax.random.PRNGKey(0)
    kx, kp = jax.random.split(key)
    x = jax.random.uniform(kx, (N, D_IN), jnp.float32)   # 2-D coordinates
    params = init_params(kp)
    kparams = pack_kernel_params(params)

    out = mlphard_forward(x, kparams)
    out = jax.block_until_ready(out)

    ref = mlphard_reference(x, params)
    assert out.shape == (N, D_OUT)
    # Slightly looser than f32 ulp because the kernel reorders the tiny
    # Fourier reduction (FMA outer product) and the layer-1 split.
    assert jnp.allclose(out, ref, atol=1e-4, rtol=1e-4)

    print("KERNEL_OK")
</pallas_src>

<mosaic_0001>
module attributes {stable_mosaic.version = 11 : i64} {
  func.func @mlphard_kernel(%arg0: memref<2x256xf32, #tpu.memory_space<vmem>>, %arg1: memref<16x2xf32, #tpu.memory_space<vmem>>, %arg2: memref<32x16xf32, #tpu.memory_space<vmem>>, %arg3: memref<32x16xf32, #tpu.memory_space<vmem>>, %arg4: memref<32x1xf32, #tpu.memory_space<vmem>>, %arg5: memref<32x32xf32, #tpu.memory_space<vmem>>, %arg6: memref<32x1xf32, #tpu.memory_space<vmem>>, %arg7: memref<32x32xf32, #tpu.memory_space<vmem>>, %arg8: memref<32x1xf32, #tpu.memory_space<vmem>>, %arg9: memref<1x32xf32, #tpu.memory_space<vmem>>, %arg10: memref<1x1xf32, #tpu.memory_space<vmem>>, %arg11: memref<1x256xf32, #tpu.memory_space<vmem>>) attributes {dimension_semantics = [], scalar_prefetch = 0 : i64, scratch_operands = 0 : i64, tpu.core_type = #tpu.core_type<tc>} {
    %c0 = arith.constant 0 : index
    %c0_0 = arith.constant 0 : index
    %0 = vector.load %arg0[%c0, %c0_0] : memref<2x256xf32, #tpu.memory_space<vmem>>, vector<2x256xf32>
    %c0_1 = arith.constant 0 : index
    %c0_2 = arith.constant 0 : index
    %1 = vector.load %arg1[%c0_1, %c0_2] : memref<16x2xf32, #tpu.memory_space<vmem>>, vector<16x1xf32>
    %2 = vector.extract_strided_slice %0 {offsets = [0, 0], sizes = [1, 256], strides = [1, 1]} : vector<2x256xf32> to vector<1x256xf32>
    %3 = vector.broadcast %1 : vector<16x1xf32> to vector<16x256xf32>
    %4 = vector.broadcast %2 : vector<1x256xf32> to vector<16x256xf32>
    %5 = arith.mulf %3, %4 : vector<16x256xf32>
    %c0_3 = arith.constant 0 : index
    %c1 = arith.constant 1 : index
    %6 = vector.load %arg1[%c0_3, %c1] : memref<16x2xf32, #tpu.memory_space<vmem>>, vector<16x1xf32>
    %7 = vector.extract_strided_slice %0 {offsets = [1, 0], sizes = [1, 256], strides = [1, 1]} : vector<2x256xf32> to vector<1x256xf32>
    %8 = vector.broadcast %6 : vector<16x1xf32> to vector<16x256xf32>
    %9 = vector.broadcast %7 : vector<1x256xf32> to vector<16x256xf32>
    %10 = arith.mulf %8, %9 : vector<16x256xf32>
    %11 = arith.addf %5, %10 : vector<16x256xf32>
    %12 = math.sin %11 : vector<16x256xf32>
    %13 = math.cos %11 : vector<16x256xf32>
    %c0_4 = arith.constant 0 : index
    %c0_5 = arith.constant 0 : index
    %14 = vector.load %arg2[%c0_4, %c0_5] : memref<32x16xf32, #tpu.memory_space<vmem>>, vector<32x16xf32>
    %cst = arith.constant dense<0.000000e+00> : vector<32x256xf32>
    %15 = tpu.matmul %14, %12, %cst {dimension_numbers = #tpu.dot_dimension_numbers<[1], [0], [0], [1], [0, 0, 1, 1], [], []>} : vector<32x16xf32>, vector<16x256xf32>, vector<32x256xf32> -> vector<32x256xf32>
    %c0_6 = arith.constant 0 : index
    %c0_7 = arith.constant 0 : index
    %16 = vector.load %arg3[%c0_6, %c0_7] : memref<32x16xf32, #tpu.memory_space<vmem>>, vector<32x16xf32>
    %cst_8 = arith.constant dense<0.000000e+00> : vector<32x256xf32>
    %17 = tpu.matmul %16, %13, %cst_8 {dimension_numbers = #tpu.dot_dimension_numbers<[1], [0], [0], [1], [0, 0, 1, 1], [], []>} : vector<32x16xf32>, vector<16x256xf32>, vector<32x256xf32> -> vector<32x256xf32>
    %18 = arith.addf %15, %17 : vector<32x256xf32>
    %c0_9 = arith.constant 0 : index
    %c0_10 = arith.constant 0 : index
    %19 = vector.load %arg4[%c0_9, %c0_10] : memref<32x1xf32, #tpu.memory_space<vmem>>, vector<32x1xf32>
    %20 = vector.broadcast %19 : vector<32x1xf32> to vector<32x256xf32>
    %21 = arith.addf %18, %20 : vector<32x256xf32>
    %22 = math.tanh %21 : vector<32x256xf32>
    %c0_11 = arith.constant 0 : index
    %c0_12 = arith.constant 0 : index
    %23 = vector.load %arg5[%c0_11, %c0_12] : memref<32x32xf32, #tpu.memory_space<vmem>>, vector<32x32xf32>
    %cst_13 = arith.constant dense<0.000000e+00> : vector<32x256xf32>
    %24 = tpu.matmul %23, %22, %cst_13 {dimension_numbers = #tpu.dot_dimension_numbers<[1], [0], [0], [1], [0, 0, 1, 1], [], []>} : vector<32x32xf32>, vector<32x256xf32>, vector<32x256xf32> -> vector<32x256xf32>
    %c0_14 = arith.constant 0 : index
    %c0_15 = arith.constant 0 : index
    %25 = vector.load %arg6[%c0_14, %c0_15] : memref<32x1xf32, #tpu.memory_space<vmem>>, vector<32x1xf32>
    %26 = vector.broadcast %25 : vector<32x1xf32> to vector<32x256xf32>
    %27 = arith.addf %24, %26 : vector<32x256xf32>
    %28 = math.tanh %27 : vector<32x256xf32>
    %c0_16 = arith.constant 0 : index
    %c0_17 = arith.constant 0 : index
    %29 = vector.load %arg7[%c0_16, %c0_17] : memref<32x32xf32, #tpu.memory_space<vmem>>, vector<32x32xf32>
    %cst_18 = arith.constant dense<0.000000e+00> : vector<32x256xf32>
    %30 = tpu.matmul %29, %28, %cst_18 {dimension_numbers = #tpu.dot_dimension_numbers<[1], [0], [0], [1], [0, 0, 1, 1], [], []>} : vector<32x32xf32>, vector<32x256xf32>, vector<32x256xf32> -> vector<32x256xf32>
    %c0_19 = arith.constant 0 : index
    %c0_20 = arith.constant 0 : index
    %31 = vector.load %arg8[%c0_19, %c0_20] : memref<32x1xf32, #tpu.memory_space<vmem>>, vector<32x1xf32>
    %32 = vector.broadcast %31 : vector<32x1xf32> to vector<32x256xf32>
    %33 = arith.addf %30, %32 : vector<32x256xf32>
    %34 = math.tanh %33 : vector<32x256xf32>
    %c0_21 = arith.constant 0 : index
    %c0_22 = arith.constant 0 : index
    %35 = vector.load %arg9[%c0_21, %c0_22] : memref<1x32xf32, #tpu.memory_space<vmem>>, vector<1x32xf32>
    %cst_23 = arith.constant dense<0.000000e+00> : vector<1x256xf32>
    %36 = tpu.matmul %35, %34, %cst_23 {dimension_numbers = #tpu.dot_dimension_numbers<[1], [0], [0], [1], [0, 0, 1, 1], [], []>} : vector<1x32xf32>, vector<32x256xf32>, vector<1x256xf32> -> vector<1x256xf32>
    %c0_24 = arith.constant 0 : index
    %c0_25 = arith.constant 0 : index
    %37 = vector.load %arg10[%c0_24, %c0_25] : memref<1x1xf32, #tpu.memory_space<vmem>>, vector<1x1xf32>
    %38 = vector.broadcast %37 : vector<1x1xf32> to vector<1x256xf32>
    %39 = arith.addf %36, %38 : vector<1x256xf32>
    %40 = arith.negf %39 : vector<1x256xf32>
    %41 = math.exp %40 : vector<1x256xf32>
    %cst_26 = arith.constant 1.000000e+00 : f32
    %42 = vector.broadcast %cst_26 : f32 to vector<1x256xf32>
    %43 = arith.addf %42, %41 : vector<1x256xf32>
    %44 = arith.divf %42, %43 : vector<1x256xf32>
    %c0_27 = arith.constant 0 : index
    %c0_28 = arith.constant 0 : index
    %45 = vector.load %arg11[%c0_27, %c0_28] : memref<1x256xf32, #tpu.memory_space<vmem>>, vector<1x256xf32>
    tpu.vector_store %arg11[%c0_27, %c0_28], %44 {strides = array<i32>} : memref<1x256xf32, #tpu.memory_space<vmem>>, vector<1x256xf32>,
    return
  }
}

</mosaic_0001>

<bundles_post_ra>
// kernel: tpu_custom_call.1
= control target key start
LH: loop header
LB: loop body
LE: loop exit
PB: predicated region body
PF: predicated region fallthrough
CT: control target
= control target key end

     0   :  { %s2708_s0 = inlined_call_operand.vmem [shape: f32[2,256], index: 0, kind: input, shape index: {}]   ;;  %s2709_s1 = inlined_call_operand.vmem [shape: f32[16,2], index: 1, kind: input, shape index: {}]   ;;  %s2710_s2 = inlined_call_operand.vmem [shape: f32[32,16], index: 2, kind: input, shape index: {}]   ;;  %s2711_s3 = inlined_call_operand.vmem [shape: f32[32,16], index: 3, kind: input, shape index: {}]   ;;  %s2712_s4 = inlined_call_operand.vmem [shape: f32[32,1], index: 4, kind: input, shape index: {}]   ;;  %s2713_s5 = inlined_call_operand.vmem [shape: f32[32,32], index: 5, kind: input, shape index: {}]   ;;  %s2714_s6 = inlined_call_operand.vmem [shape: f32[32,1], index: 6, kind: input, shape index: {}]   ;;  %s2715_s7 = inlined_call_operand.vmem [shape: f32[32,32], index: 7, kind: input, shape index: {}]   ;;  %s2716_s8 = inlined_call_operand.vmem [shape: f32[32,1], index: 8, kind: input, shape index: {}]   ;;  %s2717_s9 = inlined_call_operand.vmem [shape: f32[1,32], index: 9, kind: input, shape index: {}]   ;;  %s2718_s10 = inlined_call_operand.<no memory space> [shape: f32[1,1], index: 10, kind: input, shape index: {}]   ;;  %s2719_s11 = inlined_call_operand.hbm [shape: f32[1,256], index: 11, kind: output, shape index: {}]  }
   0x1   :  { %v16_v0 = vstv %s2718_s10 }
   0x2   :  { %17 = vst [vmem:[#allocation2] sm:$0x1] %v16_v0 }
   0x3   :  { %v43_v1 = vld [vmem:[%s2709_s1 + $0x8] sm:$0xff]  ;;  %v42_v2 = vld [vmem:[%s2709_s1] sm:$0xff] }
   0x4   :  { %18 = vsyncpa [#allocation4], 0  ;;  %v1999_v3 = vmov 0   ;;  %v2000_v4 = vmov 1   ;;  %v41_v5 = vld [vmem:[%s2708_s0] sm:$0xf] }
   0x5   :  { %1912 = vset.pattern.permute.xlu1 %v1999_v3  ;;  %1910 = vset.pattern.permute.xlu0 %v1999_v3  ;;  %v55_v8 = vperm.slane %v41_v5, 0  ;;  %v56_v9 = vperm.slane %v41_v5, 2  ;;  %v73_v10 = vperm.slane %v41_v5, 1  ;;  %v74_v11 = vperm.slane %v41_v5, 3  ;;  %s1832_s29 = sshll.u32 %s2719_s11, 4  ;;  %s1833_s29 = int_to_ptr.hbm [resolvable:$true] %s1832_s29 }
   0x6   :  { %51 = vperm.xlu0 %1910, %v43_v1   ;;  %46 = vperm.xlu1 %1912, %v42_v2   ;;  %v2001_v55 = vmov 683565275   ;;  %v2002_v57 = vmov 2475754826   ;;  %v2003_v60 = vmov 2131351028  }
   0x7   :  { %1914 = vset.pattern.permute.xlu2 %v1999_v3  ;;  %v59_v12 = vperm.slane %v55_v8, 0  ;;  %v60_v13 = vperm.slane %v56_v9, 0  ;;  %v77_v14 = vperm.slane %v73_v10, 1  ;;  %v78_v15 = vperm.slane %v74_v11, 1 }
   0x8   :  { %v2004_v63 = vmov 2102212464  }
   0xe   :  { %1911 = vset.pattern.permute.xlu0 %v2000_v4  ;;  %1913 = vset.pattern.permute.xlu1 %v2000_v4 }
   0xf   :  { %70 = vperm.xlu0 %1911, %v43_v1   ;;  %66 = vperm.xlu1 %1913, %v42_v2   ;;  %v2005_v2 = vmov 920167782  }
  0x17   :  { %1915 = vset.pattern.permute.xlu1 %v1999_v3  ;;  %1916 = vset.pattern.permute.xlu0 %v1999_v3 }
  0x78   :  { %v52_v6 = vpop.permute.xlu0 %51  ;;  %v47_v7 = vpop.permute.xlu1 %46 }
  0x79   :  { %v63_v16 = vmul.f32 %v59_v12, %v52_v6  ;;  %v64_v17 = vmul.f32 %v60_v13, %v52_v6  ;;  %v62_v18 = vmul.f32 %v60_v13, %v47_v7  ;;  %v61_v25 = vmul.f32 %v59_v12, %v47_v7 }
  0x7a   :  { %v2006_v6 = vmov 1326507024  }
  0x81   :  { %v71_v19 = vpop.permute.xlu0 %70  ;;  %v67_v20 = vpop.permute.xlu1 %66 }
  0x82   :  { %v81_v21 = vmul.f32 %v77_v14, %v71_v19  ;;  %v82_v22 = vmul.f32 %v78_v15, %v71_v19  ;;  %v79_v23 = vmul.f32 %v77_v14, %v67_v20  ;;  %v80_v24 = vmul.f32 %v78_v15, %v67_v20 }
  0x84   :  { %v2085_v26 = vadd.f32 %v81_v21, %v63_v16  ;;  %v2087_v27 = vadd.f32 %v82_v22, %v64_v17  ;;  %v2089_v28 = vadd.f32 %v80_v24, %v62_v18  ;;  %v2091_v29 = vadd.f32 %v79_v23, %v61_v25 }
  0x86   :  { %v400_v30 = vand.u32 2139095040, %v2085_v26  ;;  %v555_v31 = vand.u32 2139095040, %v2087_v27  ;;  %v90_v34 = vand.u32 2139095040, %v2091_v29  ;;  %v245_v37 = vand.u32 2139095040, %v2089_v28 }
  0x87   :  { %v397_v38 = vand.u32 2147483647, %v2085_v26  ;;  %v552_v42 = vand.u32 2147483647, %v2087_v27 }
  0x88   :  { %v401_v32 = vshrl.u32 %v400_v30, 23  ;;  %v556_v33 = vshrl.u32 %v555_v31, 23  ;;  %v91_v41 = vshrl.u32 %v90_v34, 23  ;;  %v246_v43 = vshrl.u32 %v245_v37, 23 }
  0x89   :  { %v404_v44 = vand.u32 8388607, %v397_v38  ;;  %v2105_v52 = vand.u32 8388607, %v552_v42 }
  0x8a   :  { %v1847_v35 = vadd.s32 4294967169, %v401_v32  ;;  %v1850_v36 = vadd.s32 4294967169, %v556_v33  ;;  %v1841_v48 = vadd.s32 4294967169, %v91_v41  ;;  %v2101_v50 = vadd.s32 4294967169, %v246_v43 }
  0x8b   :  { %v405_v51 = vor.u32 8388608, %v404_v44 }
  0x8c   :  { %v407_v39 = vadd.s32 1, %v1847_v35  ;;  %v562_v40 = vadd.s32 1, %v1850_v36  ;;  %v2121_v8 = vadd.s32 1, %v1841_v48 }
  0x8d   :  { %v2124_v14 = vshll.u32 %v405_v51, 8 }
  0x8e   :  { %vm408_vm0 = vcmp.gt.s32.totalorder %v407_v39, 0  ;;  %vm563_vm1 = vcmp.gt.s32.totalorder %v562_v40, 0  ;;  %vm98_vm9 = vcmp.gt.s32.totalorder %v2121_v8, 0 }
  0x8f   :  { %v409_v45 = vsel %vm408_vm0, %v407_v39, 0  ;;  %v564_v47 = vsel %vm563_vm1, %v562_v40, 0  ;;  %v446_v30 = vand.u32 65535, %v2124_v14  ;;  %v447_v31 = vshrl.u32 %v2124_v14, 16 }
  0x90   :  { %v411_v46 = vand.u32 31, %v409_v45  ;;  %v2107_v53 = vshrl.u32 %v409_v45, 5  ;;  %v2109_v54 = vand.u32 31, %v564_v47  ;;  %v2147_v36 = vshrl.u32 %v564_v47, 5 }
  0x91   :  { %v560_v40 = vor.u32 8388608, %v2105_v52  ;;  %v99_v52 = vsel %vm98_vm9, %v2121_v8, 0  ;;  %vm399_vm0 = vcmp.lt.s32.totalorder %v2085_v26, 0 }
  0x92   :  { %v412_v49 = vsub.s32 32, %v411_v46  ;;  %v414_v56 = vshll.u32 %v2001_v55, %v411_v46  ;;  %v417_v58 = vshll.u32 %v2002_v57, %v411_v46  ;;  %v420_v62 = vshll.u32 %v2003_v60, %v411_v46 }
  0x93   :  { %v423_v1 = vshll.u32 %v2004_v63, %v411_v46  ;;  %v426_v5 = vshll.u32 %v2005_v2, %v411_v46  ;;  %vm429_vm2 = vcmp.lt.s32.totalorder %v2107_v53, 1  ;;  %v2127_v15 = vsub.s32 32, %v2109_v54 }
  0x94   :  { %v415_v59 = vshrl.u32 %v2002_v57, %v412_v49  ;;  %v418_v61 = vshrl.u32 %v2003_v60, %v412_v49  ;;  %v421_v0 = vshrl.u32 %v2004_v63, %v412_v49  ;;  %v424_v4 = vshrl.u32 %v2005_v2, %v412_v49 }
  0x95   :  { %v427_v7 = vshrl.u32 %v2006_v6, %v412_v49  ;;  %vm432_vm3 = vcmp.lt.s32.totalorder %v2107_v53, 4  ;;  %v413_v18 = vshrl.u32 %v2001_v55, %v412_v49  ;;  %vm431_vm4 = vcmp.lt.s32.totalorder %v2107_v53, 3 }
  0x96   :  { %v416_v9 = vor.u32 %v415_v59, %v414_v56  ;;  %v419_v10 = vor.u32 %v418_v61, %v417_v58  ;;  %v422_v11 = vor.u32 %v421_v0, %v420_v62  ;;  %v425_v12 = vor.u32 %v424_v4, %v423_v1 }
  0x97   :  { %v428_v13 = vor.u32 %v427_v7, %v426_v5  ;;  %vm430_vm5 = vcmp.lt.s32.totalorder %v2107_v53, 2  ;;  %v569_v44 = vshll.u32 %v2001_v55, %v2109_v54  ;;  %v570_v45 = vshrl.u32 %v2002_v57, %v2127_v15 }
  0x98   :  { %v437_v16 = vsel %vm429_vm2, %v416_v9, %v419_v10  ;;  %v441_v17 = vsel %vm429_vm2, %v419_v10, %v422_v11  ;;  %v438_v19 = vsel %vm432_vm3, %v425_v12, 920167782  ;;  %v434_v21 = vsel %vm432_vm3, %v422_v11, 2102212464 }
  0x99   :  { %v442_v20 = vsel %vm432_vm3, %v428_v13, 1326507024  ;;  %v439_v22 = vsel %vm431_vm4, %v422_v11, %v438_v19  ;;  %v433_v37 = vsel %vm429_vm2, %v413_v18, %v416_v9  ;;  %v435_v39 = vsel %vm431_vm4, %v419_v10, %v434_v21 }
  0x9a   :  { %v443_v23 = vsel %vm431_vm4, %v425_v12, %v442_v20  ;;  %v440_v24 = vsel %vm430_vm5, %v437_v16, %v439_v22  ;;  %v572_v47 = vshll.u32 %v2002_v57, %v2109_v54  ;;  %v573_v49 = vshrl.u32 %v2003_v60, %v2127_v15 }
  0x9b   :  { %v444_v25 = vsel %vm430_vm5, %v441_v17, %v443_v23  ;;  %v470_v34 = vand.u32 65535, %v440_v24  ;;  %v471_v35 = vshrl.u32 %v440_v24, 16  ;;  %v2163_v11 = vor.u32 %v570_v45, %v569_v44 }
  0x9c   :  { %v448_v32 = vand.u32 65535, %v444_v25  ;;  %v449_v33 = vshrl.u32 %v444_v25, 16  ;;  %v576_v16 = vshrl.u32 %v2004_v63, %v2127_v15  ;;  %v2170_v19 = vor.u32 %v573_v49, %v572_v47 }
  0x9d   :  { %v473_v46 = vmul.u32 %v471_v35, %v446_v30  ;;  %v474_v48 = vmul.u32 %v470_v34, %v447_v31  ;;  %v472_v59 = vmul.u32 %v470_v34, %v446_v30  ;;  %v475_v0 = vmul.u32 %v471_v35, %v447_v31 }
  0x9e   :  { %v451_v41 = vmul.u32 %v449_v33, %v446_v30  ;;  %v452_v43 = vmul.u32 %v448_v32, %v447_v31  ;;  %v450_v51 = vmul.u32 %v448_v32, %v446_v30  ;;  %v453_v56 = vmul.u32 %v449_v33, %v447_v31 }
  0x9f   :  { %v476_v1 = vshll.u32 %v473_v46, 16  ;;  %v477_v5 = vshrl.u32 %v473_v46, 16  ;;  %v478_v7 = vshll.u32 %v474_v48, 16  ;;  %v575_v22 = vshll.u32 %v2003_v60, %v2109_v54 }
  0xa0   :  { %v454_v58 = vshll.u32 %v451_v41, 16  ;;  %v455_v61 = vshrl.u32 %v451_v41, 16  ;;  %v456_v62 = vshll.u32 %v452_v43, 16  ;;  %v578_v23 = vshll.u32 %v2004_v63, %v2109_v54 }
  0xa1   :  { %vm480_vm7 = vc.u32 %v472_v59, %v476_v1  ;;  %v482_v10 = vadd.s32 %v476_v1, %v472_v59  ;;  %v579_v25 = vshrl.u32 %v2005_v2, %v2127_v15  ;;  %v581_v30 = vshll.u32 %v2005_v2, %v2109_v54 }
  0xa2   :  { %vm458_vm6 = vc.u32 %v450_v51, %v454_v58  ;;  %v460_v4 = vadd.s32 %v454_v58, %v450_v51  ;;  %v481_v13 = vsel %vm480_vm7, 1, %v1999_v3  ;;  %v582_v31 = vshrl.u32 %v2006_v6, %v2127_v15 }
  0xa3   :  { %v459_v9 = vsel %vm458_vm6, 1, %v1999_v3  ;;  %v483_v18 = vadd.s32 %v481_v13, %v475_v0  ;;  %vm484_vm10 = vc.u32 %v482_v10, %v478_v7  ;;  %v457_v32 = vshrl.u32 %v452_v43, 16 }
  0xa4   :  { %v461_v12 = vadd.s32 %v459_v9, %v453_v56  ;;  %vm462_vm8 = vc.u32 %v460_v4, %v456_v62  ;;  %v485_v21 = vsel %vm484_vm10, 1, %v1999_v3  ;;  %v479_v34 = vshrl.u32 %v474_v48, 16 }
  0xa5   :  { %v463_v17 = vsel %vm462_vm8, 1, %v1999_v3  ;;  %v487_v24 = vadd.s32 %v485_v21, %v483_v18  ;;  %v577_v35 = vor.u32 %v576_v16, %v575_v22  ;;  %v580_v44 = vor.u32 %v579_v25, %v578_v23 }
  0xa6   :  { %v465_v20 = vadd.s32 %v463_v17, %v461_v12  ;;  %v583_v45 = vor.u32 %v582_v31, %v581_v30  ;;  %vm584_vm11 = vcmp.lt.s32.totalorder %v2147_v36, 1  ;;  %v2186_v47 = vadd.s32 %v482_v10, %v478_v7 }
  0xa7   :  { %v488_v41 = vadd.s32 %v487_v24, %v477_v5  ;;  %vm587_vm12 = vcmp.lt.s32.totalorder %v2147_v36, 4  ;;  %v592_v54 = vsel %vm584_vm11, %v2163_v11, %v2170_v19  ;;  %v436_v43 = vsel %vm430_vm5, %v433_v37, %v435_v39 }
  0xa8   :  { %v466_v33 = vadd.s32 %v465_v20, %v455_v61  ;;  %vm586_vm13 = vcmp.lt.s32.totalorder %v2147_v36, 3  ;;  %v593_v49 = vsel %vm587_vm12, %v580_v44, 920167782  ;;  %vm585_vm15 = vcmp.lt.s32.totalorder %v2147_v36, 2 }
  0xa9   :  { %v489_v48 = vadd.s32 %v488_v41, %v479_v34  ;;  %v594_v51 = vsel %vm586_vm13, %v577_v35, %v593_v49  ;;  %v596_v56 = vsel %vm584_vm11, %v2170_v19, %v577_v35  ;;  %v597_v39 = vsel %vm587_vm12, %v583_v45, 1326507024 }
  0xaa   :  { %v2184_v46 = vadd.s32 %v466_v33, %v457_v32  ;;  %v595_v37 = vsel %vm585_vm15, %v592_v54, %v594_v51  ;;  %v2212_v58 = vshll.u32 %v560_v40, 8  ;;  %v490_v59 = vmul.u32 %v2124_v14, %v436_v43 }
  0xab   :  { %v493_v53 = vadd.s32 1, %v489_v48  ;;  %v598_v61 = vsel %vm586_vm13, %v580_v44, %v597_v39  ;;  %v625_v62 = vand.u32 65535, %v595_v37  ;;  %v626_v0 = vshrl.u32 %v595_v37, 16 }
  0xac   :  { %vm492_vm14 = vc.u32 %v2184_v46, %v2186_v47  ;;  %v599_v4 = vsel %vm585_vm15, %v596_v56, %v598_v61  ;;  %v601_v5 = vand.u32 65535, %v2212_v58  ;;  %v602_v7 = vshrl.u32 %v2212_v58, 16 }
  0xad   :  { %v494_v1 = vsel %vm492_vm14, %v493_v53, %v489_v48  ;;  %v603_v9 = vand.u32 65535, %v599_v4  ;;  %v604_v14 = vshrl.u32 %v599_v4, 16  ;;  %v568_v10 = vshrl.u32 %v2001_v55, %v2127_v15 }
  0xae   :  { %v495_v40 = vadd.s32 %v494_v1, %v490_v59  ;;  %v628_v12 = vmul.u32 %v626_v0, %v601_v5  ;;  %v629_v13 = vmul.u32 %v625_v62, %v602_v7  ;;  %v87_v16 = vand.u32 2147483647, %v2091_v29 }
  0xaf   :  { %v252_v17 = vadd.s32 1, %v2101_v50  ;;  %v606_v20 = vmul.u32 %v604_v14, %v601_v5  ;;  %v607_v21 = vmul.u32 %v603_v9, %v602_v7  ;;  %v2228_v22 = vand.u32 31, %v99_v52 }
  0xb0   :  { %v496_v18 = vadd.s32 536870912, %v495_v40  ;;  %v588_v8 = vsel %vm584_vm11, %v568_v10, %v2163_v11  ;;  %v627_v23 = vmul.u32 %v625_v62, %v601_v5  ;;  %v631_v24 = vshll.u32 %v628_v12, 16 }
  0xb1   :  { %v589_v25 = vsel %vm587_vm12, %v577_v35, 2102212464  ;;  %v605_v30 = vmul.u32 %v603_v9, %v601_v5  ;;  %v609_v31 = vshll.u32 %v606_v20, 16  ;;  %v608_v50 = vmul.u32 %v604_v14, %v602_v7 }
  0xb2   :  { %v497_v15 = vshrl.u32 %v496_v18, 30  ;;  %v633_v32 = vshll.u32 %v629_v13, 16  ;;  %vm635_vm1 = vc.u32 %v627_v23, %v631_v24  ;;  %v637_v33 = vadd.s32 %v631_v24, %v627_v23 }
  0xb3   :  { %v611_v41 = vshll.u32 %v607_v21, 16  ;;  %vm613_vm2 = vc.u32 %v605_v30, %v609_v31  ;;  %v615_v44 = vadd.s32 %v609_v31, %v605_v30  ;;  %v630_v45 = vmul.u32 %v626_v0, %v602_v7 }
  0xb4   :  { %v498_v34 = vshll.u32 %v497_v15, 30  ;;  %v614_v11 = vsel %vm613_vm2, 1, %v1999_v3  ;;  %v636_v54 = vsel %vm635_vm1, 1, %v1999_v3  ;;  %vm639_vm3 = vc.u32 %v637_v33, %v633_v32 }
  0xb5   :  { %v590_v35 = vsel %vm586_vm13, %v2170_v19, %v589_v25  ;;  %v616_v48 = vadd.s32 %v614_v11, %v608_v50  ;;  %vm617_vm4 = vc.u32 %v615_v44, %v611_v41  ;;  %v521_v49 = vsub.s32 4, %v497_v15 }
  0xb6   :  { %v499_v43 = vsub.s32 %v495_v40, %v498_v34  ;;  %v618_v51 = vsel %vm617_vm4, 1, %v1999_v3  ;;  %v638_v56 = vadd.s32 %v636_v54, %v630_v45  ;;  %v640_v53 = vsel %vm639_vm3, 1, %v1999_v3 }
  0xb7   :  { %vm253_vm5 = vcmp.gt.s32.totalorder %v252_v17, 0  ;;  %v620_v39 = vadd.s32 %v618_v51, %v616_v48  ;;  %v2244_v59 = vsub.s32 32, %v2228_v22  ;;  %v610_v61 = vshrl.u32 %v606_v20, 16 }
  0xb8   :  { %vm500_vm6 = vcmp.lt.s32.totalorder %v499_v43, 0  ;;  %v501_v37 = vsub.s32 0, %v499_v43  ;;  %v632_v62 = vshrl.u32 %v628_v12, 16  ;;  %v642_v0 = vadd.s32 %v640_v53, %v638_v56 }
  0xb9   :  { %v591_v19 = vsel %vm585_vm15, %v588_v8, %v590_v35  ;;  %v612_v4 = vshrl.u32 %v607_v21, 16  ;;  %v634_v5 = vshrl.u32 %v629_v13, 16  ;;  %v522_v40 = vsel %vm399_vm0, %v521_v49, %v497_v15 }
  0xba   :  { %v502_v1 = vsel %vm500_vm6, %v501_v37, %v499_v43  ;;  %v621_v9 = vadd.s32 %v620_v39, %v610_v61  ;;  %v643_v14 = vadd.s32 %v642_v0, %v632_v62  ;;  %v2250_v10 = vshrl.u32 %v99_v52, 5 }
  0xbb   :  { %v503_v7 = vclz %v502_v1  ;;  %v254_v18 = vsel %vm253_vm5, %v252_v17, 0  ;;  %vm2255_vm7 = vcmp.le.f32.partialorder %v397_v38, 0.7853982  ;;  %v2261_v13 = vadd.s32 %v637_v33, %v633_v32 }
  0xbc   :  { %v2259_v20 = vadd.s32 %v621_v9, %v612_v4  ;;  %v644_v21 = vadd.s32 %v643_v14, %v634_v5  ;;  %v491_v8 = vadd.s32 %v2186_v47, %v2184_v46  ;;  %v524_v52 = vsel %vm2255_vm7, 0, %v522_v40 }
  0xbd   :  { %v1848_v36 = vadd.s32 4294967294, %v503_v7  ;;  %v645_v17 = vmul.u32 %v2212_v58, %v591_v19  ;;  %v94_v38 = vand.u32 8388607, %v87_v16  ;;  %v105_v24 = vshrl.u32 %v2002_v57, %v2244_v59 }
  0xbe   :  { %vm647_vm9 = vc.u32 %v2259_v20, %v2261_v13  ;;  %v648_v23 = vadd.s32 1, %v644_v21  ;;  %v107_v46 = vshll.u32 %v2002_v57, %v2228_v22  ;;  %v108_v47 = vshrl.u32 %v2003_v60, %v2244_v59 }
  0xbf   :  { %vm1849_vm8 = vcmp.lt.s32.totalorder %v1848_v36, 0  ;;  %v111_v58 = vshrl.u32 %v2004_v63, %v2244_v59  ;;  %v110_v50 = vshll.u32 %v2003_v60, %v2228_v22  ;;  %v113_v34 = vshll.u32 %v2004_v63, %v2228_v22 }
  0xc0   :  { %v506_v15 = vsel %vm1849_vm8, 0, %v1848_v36  ;;  %v649_v31 = vsel %vm647_vm9, %v648_v23, %v644_v21  ;;  %v114_v41 = vshrl.u32 %v2005_v2, %v2244_v59  ;;  %v116_v45 = vshll.u32 %v2005_v2, %v2228_v22 }
  0xc1   :  { %v507_v25 = vsub.s32 32, %v506_v15  ;;  %v511_v30 = vsub.s32 4294967266, %v506_v15  ;;  %v508_v32 = vshll.u32 %v499_v43, %v506_v15  ;;  %v650_v33 = vadd.s32 %v649_v31, %v645_v17 }
  0xc2   :  { %v117_v54 = vshrl.u32 %v2006_v6, %v2244_v59  ;;  %v104_v48 = vshll.u32 %v2001_v55, %v2228_v22  ;;  %v2292_v43 = vor.u32 %v108_v47, %v107_v46  ;;  %v112_v49 = vor.u32 %v111_v58, %v110_v50 }
  0xc3   :  { %v509_v44 = vshrl.u32 %v491_v8, %v507_v25  ;;  %v512_v11 = vadd.s32 127, %v511_v30  ;;  %v651_v35 = vadd.s32 536870912, %v650_v33  ;;  %v115_v53 = vor.u32 %v114_v41, %v113_v34 }
  0xc4   :  { %v118_v37 = vor.u32 %v117_v54, %v116_v45  ;;  %v2294_v39 = vand.u32 31, %v254_v18  ;;  %v95_v62 = vor.u32 8388608, %v94_v38  ;;  %v541_v1 = vadd.s32 3, %v524_v52 }
  0xc5   :  { %v510_v51 = vor.u32 %v509_v44, %v508_v32  ;;  %v513_v56 = vshll.u32 %v512_v11, 23  ;;  %v2296_v61 = vshrl.u32 %v651_v35, 30  ;;  %v106_v19 = vor.u32 %v105_v24, %v104_v48 }
  0xc6   :  { %vm119_vm10 = vcmp.lt.s32.totalorder %v2250_v10, 1  ;;  %vm121_vm11 = vcmp.lt.s32.totalorder %v2250_v10, 3  ;;  %vm122_vm12 = vcmp.lt.s32.totalorder %v2250_v10, 4  ;;  %vm120_vm13 = vcmp.lt.s32.totalorder %v2250_v10, 2 }
  0xc7   :  { %v514_v0 = vor.u32 4788187, %v513_v56  ;;  %v517_v4 = vcvt.s32.f32 %v510_v51  ;;  %v653_v22 = vshll.u32 %v2296_v61, 30  ;;  %v128_v7 = vsel %vm122_vm12, %v115_v53, 920167782 }
  0xc8   :  { %v131_v40 = vsel %vm119_vm10, %v2292_v43, %v112_v49  ;;  %v132_v9 = vsel %vm122_vm12, %v118_v37, 1326507024  ;;  %v2314_v21 = vshll.u32 %v95_v62, 8  ;;  %v2316_v8 = vshrl.u32 %v254_v18, 5 }
  0xc9   :  { %v515_v5 = vand.u32 2147483647, %v514_v0  ;;  %v2309_v14 = vsub.s32 %v650_v33, %v653_v22  ;;  %v133_v36 = vsel %vm121_vm11, %v115_v53, %v132_v9  ;;  %v127_v24 = vsel %vm119_vm10, %v106_v19, %v2292_v43 }
  0xca   :  { %v134_v38 = vsel %vm120_vm13, %v131_v40, %v133_v36  ;;  %v129_v15 = vsel %vm121_vm11, %v112_v49, %v128_v7  ;;  %v2328_v46 = vsub.s32 32, %v2294_v39  ;;  %v2330_v47 = vand.u32 3, %v524_v52 }
  0xcb   :  { %v518_v17 = vmul.f32 %v517_v4, %v515_v5  ;;  %vm655_vm14 = vcmp.lt.s32.totalorder %v2309_v14, 0  ;;  %v656_v23 = vsub.s32 0, %v2309_v14  ;;  %v138_v58 = vand.u32 65535, %v134_v38 }
  0xcc   :  { %v2333_v30 = vand.u32 3, %v541_v1  ;;  %v103_v31 = vshrl.u32 %v2001_v55, %v2244_v59  ;;  %v2338_v50 = vshrl.u32 %v2314_v21, 16  ;;  %v130_v34 = vsel %vm120_vm13, %v127_v24, %v129_v15 }
  0xcd   :  { %v519_v18 = vxor.u32 2147483648, %v518_v17  ;;  %v657_v25 = vsel %vm655_vm14, %v656_v23, %v2309_v14  ;;  %v139_v52 = vshrl.u32 %v134_v38, 16  ;;  %v646_v44 = vadd.s32 %v2261_v13, %v2259_v20 }
  0xce   :  { %v658_v33 = vclz %v657_v25  ;;  %v136_v59 = vand.u32 65535, %v2314_v21  ;;  %v2353_v11 = vmul.u32 %v138_v58, %v2338_v50  ;;  %v2359_v35 = vsel %vm119_vm10, %v103_v31, %v106_v19 }
  0xcf   :  { %v520_v32 = vsel %vm399_vm0, %v519_v18, %v518_v17  ;;  %v124_v12 = vsel %vm122_vm12, %v112_v49, 2102212464  ;;  %vm554_vm15 = vcmp.lt.s32.totalorder %v2087_v27, 0  ;;  %v676_v20 = vsub.s32 4, %v2296_v61 }
  0xd0   :  { %v2347_v41 = vsel %vm2255_vm7, %v2085_v26, %v520_v32  ;;  %v1851_v54 = vadd.s32 4294967294, %v658_v33  ;;  %v141_v13 = vmul.u32 %v139_v52, %v136_v59  ;;  %v160_v48 = vand.u32 65535, %v130_v34 }
  0xd1   :  { %v525_v45 = vmul.f32 %v2347_v41, %v2347_v41  ;;  %v161_v51 = vshrl.u32 %v130_v34, 16  ;;  %v140_v37 = vmul.u32 %v138_v58, %v136_v59  ;;  %v143_v0 = vmul.u32 %v139_v52, %v2338_v50 }
  0xd2   :  { %vm1852_vm0 = vcmp.lt.s32.totalorder %v1851_v54, 0  ;;  %v144_v1 = vshll.u32 %v141_v13, 16  ;;  %v146_v19 = vshll.u32 %v2353_v11, 16  ;;  %vm2371_vm2 = vcmp.le.f32.partialorder %v552_v42, 0.7853982 }
  0xd3   :  { %v526_v56 = vmul.f32 -0.001358992, %v525_v45  ;;  %v533_v53 = vmul.f32 -0.00019511016, %v525_v45  ;;  %v661_v62 = vsel %vm1852_vm0, 0, %v1851_v54  ;;  %v163_v9 = vmul.u32 %v161_v51, %v136_v59 }
  0xd4   :  { %v662_v49 = vsub.s32 32, %v661_v62  ;;  %v663_v5 = vshll.u32 %v2309_v14, %v661_v62  ;;  %v666_v7 = vsub.s32 4294967266, %v661_v62  ;;  %vm148_vm1 = vc.u32 %v140_v37, %v144_v1 }
  0xd5   :  { %v527_v4 = vadd.f32 0.041655596, %v526_v56  ;;  %v534_v22 = vadd.f32 0.008332121, %v533_v53  ;;  %v150_v40 = vadd.s32 %v144_v1, %v140_v37  ;;  %v149_v23 = vsel %vm148_vm1, 1, %v1999_v3 }
  0xd6   :  { %v664_v38 = vshrl.u32 %v646_v44, %v662_v49  ;;  %v667_v15 = vadd.s32 127, %v666_v7  ;;  %v151_v18 = vadd.s32 %v149_v23, %v143_v0  ;;  %v164_v14 = vmul.u32 %v160_v48, %v2338_v50 }
  0xd7   :  { %v528_v36 = vmul.f32 %v527_v4, %v525_v45  ;;  %v535_v17 = vmul.f32 %v534_v22, %v525_v45  ;;  %vm152_vm3 = vc.u32 %v150_v40, %v146_v19  ;;  %vm1164_vm4 = vcmp.eq.s32.totalorder %v2330_v47, 2 }
  0xd8   :  { %v125_v31 = vsel %vm121_vm11, %v2292_v43, %v124_v12  ;;  %v153_v32 = vsel %vm152_vm3, 1, %v1999_v3  ;;  %vm1161_vm5 = vcmp.eq.s32.totalorder %v2330_v47, 0  ;;  %v665_v42 = vor.u32 %v664_v38, %v663_v5 }
  0xd9   :  { %v529_v58 = vadd.f32 -0.4999988, %v528_v36  ;;  %v536_v25 = vadd.f32 -0.16666654, %v535_v17  ;;  %v668_v33 = vshll.u32 %v667_v15, 23  ;;  %vm544_vm6 = vcmp.eq.s32.totalorder %v2333_v30, 0 }
  0xda   :  { %vm547_vm7 = vcmp.eq.s32.totalorder %v2333_v30, 2  ;;  %v155_v34 = vadd.s32 %v153_v32, %v151_v18  ;;  %v166_v52 = vshll.u32 %v163_v9, 16  ;;  %vm1160_vm8 = vcmp.lt.s32.totalorder %v2330_v47, 2 }
  0xdb   :  { %v530_v44 = vmul.f32 %v529_v58, %v525_v45  ;;  %v537_v54 = vmul.f32 %v536_v25, %v525_v45  ;;  %v677_v43 = vsel %vm554_vm15, %v676_v20, %v2296_v61  ;;  %vm543_vm9 = vcmp.lt.s32.totalorder %v2333_v30, 2 }
  0xdc   :  { %v162_v12 = vmul.u32 %v160_v48, %v136_v59  ;;  %vm540_vm10 = vweird.f32 %v2085_v26  ;;  %v669_v56 = vor.u32 4788187, %v668_v33  ;;  %v145_v53 = vshrl.u32 %v141_v13, 16 }
  0xdd   :  { %v165_v37 = vmul.u32 %v161_v51, %v2338_v50  ;;  %v168_v62 = vshll.u32 %v164_v14, 16  ;;  %v531_v0 = vadd.f32 1.0, %v530_v44  ;;  %v538_v1 = vadd.f32 1.0, %v537_v54 }
  0xde   :  { %vm170_vm11 = vc.u32 %v162_v12, %v166_v52  ;;  %v172_v45 = vadd.s32 %v166_v52, %v162_v12  ;;  %v670_v19 = vand.u32 2147483647, %v669_v56  ;;  %v672_v4 = vcvt.s32.f32 %v665_v42 }
  0xdf   :  { %v156_v22 = vadd.s32 %v155_v34, %v145_v53  ;;  %v171_v49 = vsel %vm170_vm11, 1, %v1999_v3  ;;  %v539_v61 = vmul.f32 %v538_v1, %v2347_v41  ;;  %v548_v20 = vxor.u32 2147483648, %v531_v0 }
  0xe0   :  { %v173_v59 = vadd.s32 %v171_v49, %v165_v37  ;;  %vm174_vm12 = vc.u32 %v172_v45, %v168_v62  ;;  %v673_v48 = vmul.f32 %v672_v4, %v670_v19  ;;  %v126_v50 = vsel %vm120_vm13, %v2359_v35, %v125_v31 }
  0xe1   :  { %v147_v13 = vshrl.u32 %v2353_v11, 16  ;;  %v175_v51 = vsel %vm174_vm12, 1, %v1999_v3  ;;  %v545_v5 = vxor.u32 2147483648, %v539_v61  ;;  %v679_v7 = vsel %vm2371_vm2, 0, %v677_v43 }
  0xe2   :  { %v167_v40 = vshrl.u32 %v163_v9, 16  ;;  %v177_v36 = vadd.s32 %v175_v51, %v173_v59  ;;  %v1166_v41 = vsel %vm1164_vm4, %v548_v20, %v539_v61  ;;  %v674_v17 = vxor.u32 2147483648, %v673_v48 }
  0xe3   :  { %v2402_v38 = vadd.s32 %v156_v22, %v147_v13  ;;  %v169_v23 = vshrl.u32 %v164_v14, 16  ;;  %v1163_v10 = vsel %vm1161_vm5, %v531_v0, %v545_v5  ;;  %v546_v11 = vsel %vm544_vm6, %v531_v0, %v545_v5 }
  0xe4   :  { %v549_v35 = vsel %vm547_vm7, %v548_v20, %v539_v61  ;;  %v178_v15 = vadd.s32 %v177_v36, %v167_v40  ;;  %v1167_v9 = vsel %vm1160_vm8, %v1163_v10, %v1166_v41  ;;  %v675_v18 = vsel %vm554_vm15, %v674_v17, %v673_v48 }
  0xe5   :  { %v550_v58 = vsel %vm543_vm9, %v546_v11, %v549_v35  ;;  %v2416_v14 = vadd.s32 %v172_v45, %v168_v62  ;;  %v1168_v25 = vsel %vm540_vm10, nan, %v1167_v9  ;;  %v2423_v31 = vsel %vm2371_vm2, %v2087_v27, %v675_v18 }
  0xe6   :  { %v551_v47 = vsel %vm540_vm10, nan, %v550_v58  ;;  %v179_v32 = vadd.s32 %v178_v15, %v169_v23  ;;  %1358 = vmatpush.msra.mxu0 %v1168_v25  ;;  %v680_v42 = vmul.f32 %v2423_v31, %v2423_v31  ;;  %v2429_v30 = vand.u32 3, %v679_v7 }
  0xe7   :  { %1428 = vmatpush.msra.mxu2 %v551_v47  ;;  %v696_v33 = vadd.s32 3, %v679_v7  ;;  %vm182_vm13 = vc.u32 %v2402_v38, %v2416_v14  ;;  %v180_v34 = vmul.u32 %v2314_v21, %v126_v50  ;;  %v242_v52 = vand.u32 2147483647, %v2089_v28 }
  0xe8   :  { %v183_v24 = vadd.s32 1, %v179_v32  ;;  %v260_v26 = vshrl.u32 %v2002_v57, %v2328_v46  ;;  %v681_v44 = vmul.f32 -0.001358992, %v680_v42  ;;  %v688_v54 = vmul.f32 -0.00019511016, %v680_v42 }
  0xe9   :  { %v259_v43 = vshll.u32 %v2001_v55, %v2294_v39  ;;  %v263_v12 = vshrl.u32 %v2003_v60, %v2328_v46  ;;  %v262_v53 = vshll.u32 %v2002_v57, %v2294_v39  ;;  %v265_v21 = vshll.u32 %v2003_v60, %v2294_v39 }
  0xea   :  { %v184_v56 = vsel %vm182_vm13, %v183_v24, %v179_v32  ;;  %v266_v37 = vshrl.u32 %v2004_v63, %v2328_v46  ;;  %v682_v62 = vadd.f32 0.041655596, %v681_v44  ;;  %v689_v0 = vadd.f32 0.008332121, %v688_v54 }
  0xeb   :  { %v185_v1 = vadd.s32 %v184_v56, %v180_v34  ;;  %v2447_v45 = vor.u32 %v260_v26, %v259_v43  ;;  %v268_v19 = vshll.u32 %v2004_v63, %v2294_v39  ;;  %v269_v4 = vshrl.u32 %v2005_v2, %v2328_v46 }
  0xec   :  { %v271_v57 = vshll.u32 %v2005_v2, %v2294_v39  ;;  %v272_v60 = vshrl.u32 %v2006_v6, %v2328_v46  ;;  %v683_v22 = vmul.f32 %v682_v62, %v680_v42  ;;  %v690_v49 = vmul.f32 %v689_v0, %v680_v42 }
  0xed   :  { %v186_v61 = vadd.s32 536870912, %v185_v1  ;;  %v2457_v20 = vor.u32 %v263_v12, %v262_v53  ;;  %v249_v59 = vand.u32 8388607, %v242_v52  ;;  %v2461_v48 = vor.u32 %v266_v37, %v265_v21 }
  0xee   :  { %v270_v63 = vor.u32 %v269_v4, %v268_v19  ;;  %v273_v50 = vor.u32 %v272_v60, %v271_v57  ;;  %v684_v13 = vadd.f32 -0.4999988, %v683_v22  ;;  %v691_v51 = vadd.f32 -0.16666654, %v690_v49 }
  0xef   :  { %v2463_v5 = vshrl.u32 %v186_v61, 30  ;;  %vm277_vm14 = vcmp.lt.s32.totalorder %v2316_v8, 4  ;;  %vm274_vm15 = vcmp.lt.s32.totalorder %v2316_v8, 1  ;;  %vm276_vm0 = vcmp.lt.s32.totalorder %v2316_v8, 3 }
  0xf0   :  { %v283_v2 = vsel %vm277_vm14, %v270_v63, 920167782  ;;  %v685_v6 = vmul.f32 %v684_v13, %v680_v42  ;;  %v692_v39 = vmul.f32 %v691_v51, %v680_v42  ;;  %vm1314_vm1 = vcmp.lt.s32.totalorder %v2429_v30, 2 }
  0xf1   :  { %v188_v7 = vshll.u32 %v2463_v5, 30  ;;  %v282_v40 = vsel %vm274_vm15, %v2447_v45, %v2457_v20  ;;  %vm695_vm2 = vweird.f32 %v2087_v27  ;;  %v697_v36 = vand.u32 3, %v696_v33 }
  0xf2   :  { %v250_v41 = vor.u32 8388608, %v249_v59  ;;  %v284_v17 = vsel %vm276_vm0, %v2461_v48, %v283_v2  ;;  %v287_v23 = vsel %vm277_vm14, %v273_v50, 1326507024  ;;  %v686_v10 = vadd.f32 1.0, %v685_v6 }
  0xf3   :  { %v693_v11 = vadd.f32 1.0, %v692_v39  ;;  %v189_v35 = vsub.s32 %v185_v1, %v188_v7  ;;  %vm275_vm3 = vcmp.lt.s32.totalorder %v2316_v8, 2  ;;  %vm1315_vm4 = vcmp.eq.s32.totalorder %v2429_v30, 0 }
  0xf4   :  { %v285_v15 = vsel %vm275_vm3, %v282_v40, %v284_v17  ;;  %v286_v9 = vsel %vm274_vm15, %v2457_v20, %v2461_v48  ;;  %v288_v18 = vsel %vm276_vm0, %v270_v63, %v287_v23  ;;  %v703_v25 = vxor.u32 2147483648, %v686_v10 }
  0xf5   :  { %v694_v58 = vmul.f32 %v693_v11, %v2423_v31  ;;  %vm190_vm5 = vcmp.lt.s32.totalorder %v189_v35, 0  ;;  %v191_v47 = vsub.s32 0, %v189_v35  ;;  %vm1318_vm6 = vcmp.eq.s32.totalorder %v2429_v30, 2 }
  0xf6   :  { %vm698_vm7 = vcmp.lt.s32.totalorder %v697_v36, 2  ;;  %vm699_vm8 = vcmp.eq.s32.totalorder %v697_v36, 0  ;;  %v2494_v32 = vshll.u32 %v250_v41, 8  ;;  %vm702_vm9 = vcmp.eq.s32.totalorder %v697_v36, 2 }
  0xf7   :  { %v700_v42 = vxor.u32 2147483648, %v694_v58  ;;  %v192_v33 = vsel %vm190_vm5, %v191_v47, %v189_v35  ;;  %v289_v34 = vsel %vm275_vm3, %v286_v9, %v288_v18  ;;  %v1320_v24 = vsel %vm1318_vm6, %v703_v25, %v694_v58 }
  0xf8   :  { %v704_v26 = vsel %vm702_vm9, %v703_v25, %v694_v58  ;;  %v193_v44 = vclz %v192_v33  ;;  %v315_v54 = vand.u32 65535, %v285_v15  ;;  %v291_v12 = vand.u32 65535, %v2494_v32 }
  0xf9   :  { %v1317_v31 = vsel %vm1315_vm4, %v686_v10, %v700_v42  ;;  %v701_v43 = vsel %vm699_vm8, %v686_v10, %v700_v42  ;;  %v292_v56 = vshrl.u32 %v2494_v32, 16  ;;  %v293_v62 = vand.u32 65535, %v289_v34 }
  0xfa   :  { %v1321_v53 = vsel %vm1314_vm1, %v1317_v31, %v1320_v24  ;;  %v705_v21 = vsel %vm698_vm7, %v701_v43, %v704_v26  ;;  %v1842_v37 = vadd.s32 4294967294, %v193_v44  ;;  %v294_v19 = vshrl.u32 %v289_v34, 16 }
  0xfb   :  { %v1322_v0 = vsel %vm695_vm2, nan, %v1321_v53  ;;  %v706_v1 = vsel %vm695_vm2, nan, %v705_v21  ;;  %v316_v4 = vshrl.u32 %v285_v15, 16  ;;  %v297_v22 = vmul.u32 %v293_v62, %v292_v56 }
  0xfc   :  { %1387 = vmatpush.msra.mxu1 %v1322_v0  ;;  %1457 = vmatpush.msra.mxu3 %v706_v1  ;;  %vm1843_vm10 = vcmp.lt.s32.totalorder %v1842_v37, 0  ;;  %v296_v60 = vmul.u32 %v294_v19, %v291_v12  ;;  %v181_v49 = vadd.s32 %v2416_v14, %v2402_v38  ;;  %v295_v63 = vmul.u32 %v293_v62, %v291_v12 }
  0xfd   :  { %v196_v57 = vsel %vm1843_vm10, 0, %v1842_v37  ;;  %v318_v30 = vmul.u32 %v316_v4, %v291_v12  ;;  %v298_v50 = vmul.u32 %v294_v19, %v292_v56  ;;  %v317_v51 = vmul.u32 %v315_v54, %v291_v12 }
  0xfe   :  { %v197_v61 = vsub.s32 32, %v196_v57  ;;  %v201_v59 = vsub.s32 4294967266, %v196_v57  ;;  %v299_v13 = vshll.u32 %v296_v60, 16  ;;  %v319_v27 = vmul.u32 %v315_v54, %v292_v56 }
  0xff   :  { %v198_v2 = vshll.u32 %v189_v35, %v196_v57  ;;  %v321_v7 = vshll.u32 %v318_v30, 16  ;;  %v301_v40 = vshll.u32 %v297_v22, 16  ;;  %v320_v41 = vmul.u32 %v316_v4, %v292_v56 }
 0x100   :  { %v199_v6 = vshrl.u32 %v181_v49, %v197_v61  ;;  %v202_v39 = vadd.s32 127, %v201_v59  ;;  %vm303_vm11 = vc.u32 %v295_v63, %v299_v13  ;;  %v305_v36 = vadd.s32 %v299_v13, %v295_v63 }
 0x101   :  { %v304_v10 = vsel %vm303_vm11, 1, %v1999_v3  ;;  %v323_v38 = vshll.u32 %v319_v27, 16  ;;  %vm325_vm13 = vc.u32 %v317_v51, %v321_v7  ;;  %v327_v11 = vadd.s32 %v321_v7, %v317_v51 }
 0x102   :  { %v200_v17 = vor.u32 %v199_v6, %v198_v2  ;;  %v203_v23 = vshll.u32 %v202_v39, 23  ;;  %v306_v14 = vadd.s32 %v304_v10, %v298_v50  ;;  %vm307_vm12 = vc.u32 %v305_v36, %v301_v40 }
 0x103   :  { %v279_v35 = vsel %vm277_vm14, %v2461_v48, 2102212464  ;;  %v308_v9 = vsel %vm307_vm12, 1, %v1999_v3  ;;  %v326_v18 = vsel %vm325_vm13, 1, %v1999_v3  ;;  %v300_v58 = vshrl.u32 %v296_v60, 16 }
 0x104   :  { %v204_v15 = vor.u32 4788187, %v203_v23  ;;  %v310_v25 = vadd.s32 %v308_v9, %v306_v14  ;;  %v328_v47 = vadd.s32 %v326_v18, %v320_v41  ;;  %vm329_vm1 = vc.u32 %v327_v11, %v323_v38 }
 0x105   :  { %v207_v33 = vcvt.s32.f32 %v200_v17  ;;  %v258_v34 = vshrl.u32 %v2001_v55, %v2328_v46  ;;  %v330_v24 = vsel %vm329_vm1, 1, %v1999_v3  ;;  %v302_v26 = vshrl.u32 %v297_v22, 16 }
 0x106   :  { %v205_v42 = vand.u32 2147483647, %v204_v15  ;;  %v311_v44 = vadd.s32 %v310_v25, %v300_v58  ;;  %v322_v54 = vshrl.u32 %v318_v30, 16  ;;  %v332_v31 = vadd.s32 %v330_v24, %v328_v47 }
 0x107   :  { %v278_v43 = vsel %vm274_vm15, %v258_v34, %v2447_v45  ;;  %v280_v12 = vsel %vm276_vm0, %v2457_v20, %v279_v35  ;;  %v324_v53 = vshrl.u32 %v319_v27, 16  ;;  %v331_v55 = vadd.s32 %v327_v11, %v323_v38 }
 0x108   :  { %v208_v48 = vmul.f32 %v207_v33, %v205_v42  ;;  %v312_v56 = vadd.s32 %v311_v44, %v302_v26  ;;  %v333_v21 = vadd.s32 %v332_v31, %v322_v54  ;;  %vm89_vm14 = vcmp.lt.s32.totalorder %v2091_v29, 0 }
 0x109   :  { %v281_v3 = vsel %vm275_vm3, %v278_v43, %v280_v12  ;;  %vm2531_vm2 = vcmp.le.f32.partialorder %v87_v16, 0.7853982  ;;  %v211_v16 = vsub.s32 4, %v2463_v5  ;;  %vm230_vm6 = vweird.f32 %v2091_v29 }
 0x10a   :  { %v209_v37 = vxor.u32 2147483648, %v208_v48  ;;  %v334_v46 = vadd.s32 %v333_v21, %v324_v53  ;;  %vm337_vm15 = vc.u32 %v312_v56, %v331_v55  ;;  %v335_v8 = vmul.u32 %v2494_v32, %v281_v3  ;;  %v2556_v53 = vld [vmem:[%s2710_s2] sm:$0xff] }
 0x10b   :  { %v212_v50 = vsel %vm89_vm14, %v211_v16, %v2463_v5  ;;  %v336_v25 = vadd.s32 %v331_v55, %v312_v56  ;;  %vm1331_vm11 = vcmask 130048   ;;  %v2561_v56 = vld [vmem:[%s2711_s3] sm:$0xff]  ;;  %vm244_vm12 = vcmp.lt.s32.totalorder %v2089_v28, 0 }
 0x10c   :  { %v210_v45 = vsel %vm89_vm14, %v209_v37, %v208_v48  ;;  %v338_v0 = vadd.s32 1, %v334_v46  ;;  %v214_v27 = vsel %vm2531_vm2, 0, %v212_v50  ;;  %vm243_vm13 = vcmp.le.f32.partialorder %v242_v52, 0.7853982 }
 0x10d   :  { %v213_v20 = vsel %vm2531_vm2, %v2091_v29, %v210_v45  ;;  %v851_v41 = vand.u32 3, %v214_v27  ;;  %v231_v11 = vadd.s32 3, %v214_v27  ;;  %v2575_v29 = vld [vmem:[%s2710_s2 + $0x8] sm:$0xff] }
 0x10e   :  { %v215_v1 = vmul.f32 %v213_v20, %v213_v20  ;;  %v339_v19 = vsel %vm337_vm15, %v338_v0, %v334_v46  ;;  %v2580_v45 = vld [vmem:[%s2711_s3 + $0x8] sm:$0xff] }
 0x10f   :  { %v340_v60 = vadd.s32 %v339_v19, %v335_v8  ;;  %vm853_vm3 = vcmp.eq.s32.totalorder %v851_v41, 0  ;;  %vm856_vm4 = vcmp.eq.s32.totalorder %v851_v41, 2  ;;  %vm852_vm5 = vcmp.lt.s32.totalorder %v851_v41, 2  ;;  %v1474_v41 = vld [vmem:[%s2712_s4 + $0x10] sm:$0xff] }
 0x110   :  { %v216_v4 = vmul.f32 -0.001358992, %v215_v1  ;;  %v223_v57 = vmul.f32 -0.00019511016, %v215_v1  ;;  %v232_v33 = vand.u32 3, %v231_v11 }
 0x111   :  { %v341_v49 = vadd.s32 536870912, %v340_v60 }
 0x112   :  { %v217_v22 = vadd.f32 0.041655596, %v216_v4  ;;  %v224_v30 = vadd.f32 0.008332121, %v223_v57  ;;  %vm234_vm8 = vcmp.eq.s32.totalorder %v232_v33, 0  ;;  %vm237_vm9 = vcmp.eq.s32.totalorder %v232_v33, 2 }
 0x113   :  { %v2542_v63 = vshrl.u32 %v341_v49, 30  ;;  %vm233_vm10 = vcmp.lt.s32.totalorder %v232_v33, 2  ;;  %v1475_v49 = vld [vmem:[%s2712_s4 + $0x18] sm:$0xff]  ;;  %v1623_v33 = vld [vmem:[%s2716_s8] sm:$0xff] }
 0x114   :  { %v218_v61 = vmul.f32 %v217_v22, %v215_v1  ;;  %v225_v59 = vmul.f32 %v224_v30, %v215_v1  ;;  %1493 = vperm.xlu2 %1914, %v1475_v49   ;;  %v1513_v49 = vld [vmem:[%s2713_s5 + $0x8] sm:$0xff] }
 0x115   :  { %v343_v32 = vshll.u32 %v2542_v63, 30 }
 0x116   :  { %v219_v13 = vadd.f32 -0.4999988, %v218_v61  ;;  %v226_v51 = vadd.f32 -0.16666654, %v225_v59  ;;  %v1329_v61 = vld [vmem:[%s2711_s3 + $0x10] sm:$0xff]  ;;  %v1473_v59 = vld [vmem:[%s2712_s4 + $0x8] sm:$0xff] }
 0x117   :  { %v344_v39 = vsub.s32 %v340_v60, %v343_v32  ;;  %v1325_v60 = vld [vmem:[%s2710_s2 + $0x10] sm:$0xff]  ;;  %1483 = vperm.xlu1 %1915, %v1473_v59  }
 0x118   :  { %v220_v2 = vmul.f32 %v219_v13, %v215_v1  ;;  %v227_v6 = vmul.f32 %v226_v51, %v215_v1 }
 0x119   :  { %vm345_vm0 = vcmp.lt.s32.totalorder %v344_v39, 0  ;;  %v346_v36 = vsub.s32 0, %v344_v39 }
 0x11a   :  { %v221_v7 = vadd.f32 1.0, %v220_v2  ;;  %v228_v40 = vadd.f32 1.0, %v227_v6 }
 0x11b   :  { %v347_v10 = vsel %vm345_vm0, %v346_v36, %v344_v39 }
 0x11c   :  { %v229_v17 = vmul.f32 %v228_v40, %v213_v20  ;;  %v238_v23 = vxor.u32 2147483648, %v221_v7  ;;  %v348_v38 = vclz %v347_v10  ;;  %v366_v20 = vsub.s32 4, %v2542_v63  ;;  %1488 = vperm.xlu2 %1914, %v1474_v41   ;;  %v1625_v41 = vld [vmem:[%s2716_s8 + $0x10] sm:$0xff] }
 0x11e   :  { %v235_v5 = vxor.u32 2147483648, %v229_v17  ;;  %v1845_v14 = vadd.s32 4294967294, %v348_v38  ;;  %v858_v35 = vsel %vm856_vm4, %v238_v23, %v229_v17  ;;  %v239_v48 = vsel %vm237_vm9, %v238_v23, %v229_v17  ;;  %v1330_v17 = vld [vmem:[%s2711_s3 + $0x18] sm:$0xff]  ;;  %v1518_v23 = vld [vmem:[%s2714_s6 + $0x10] sm:$0xff] }
 0x11f   :  { %v367_v19 = vsel %vm244_vm12, %v366_v20, %v2542_v63  ;;  %1532 = vperm.xlu1 %1915, %v1518_v23   ;;  %vm385_vm4 = vweird.f32 %v2089_v28 }
 0x120   :  { %v855_v15 = vsel %vm853_vm3, %v221_v7, %v235_v5  ;;  %vm1846_vm7 = vcmp.lt.s32.totalorder %v1845_v14, 0  ;;  %v236_v31 = vsel %vm234_vm8, %v221_v7, %v235_v5  ;;  %v369_v16 = vsel %vm243_vm13, 0, %v367_v19  ;;  %v1326_v7 = vld [vmem:[%s2710_s2 + $0x18] sm:$0xff] }
 0x121   :  { %v859_v9 = vsel %vm852_vm5, %v855_v15, %v858_v35  ;;  %v351_v58 = vsel %vm1846_vm7, 0, %v1845_v14  ;;  %v240_v12 = vsel %vm233_vm10, %v236_v31, %v239_v48  ;;  %v386_v13 = vadd.s32 3, %v369_v16 }
 0x122   :  { %v860_v18 = vsel %vm230_vm6, nan, %v859_v9  ;;  %v352_v47 = vsub.s32 32, %v351_v58  ;;  %v356_v42 = vsub.s32 4294967266, %v351_v58  ;;  %v353_v34 = vshll.u32 %v344_v39, %v351_v58  ;;  %v1472_v58 = vld [vmem:[%s2712_s4] sm:$0xff] }
 0x123   :  { %1359 = vmatpush.msra.mxu0 %v860_v18  ;;  %v241_v21 = vsel %vm230_vm6, nan, %v240_v12  ;;  %v1005_v6 = vand.u32 3, %v369_v16  ;;  %v387_v39 = vand.u32 3, %v386_v13  ;;  %vm1540_vm5 = vcmask 261120  }
 0x124   :  { %v354_v24 = vshrl.u32 %v336_v25, %v352_v47  ;;  %v357_v26 = vadd.s32 127, %v356_v42  ;;  %1865 = vmatmul.msk.f32.vlgmr.msra.gmra.mxu0 %vm1331_vm11, %v2561_v56  ;;  %1429 = vmatpush.msra.mxu2 %v241_v21  ;;  %v1516_v25 = vld [vmem:[%s2714_s6] sm:$0xff]  ;;  %v1624_v47 = vld [vmem:[%s2716_s8 + $0x8] sm:$0xff]  ;;  %v1626_v42 = vld [vmem:[%s2716_s8 + $0x18] sm:$0xff] }
 0x125   :  { %1873 = vmatmul.msk.f32.vlgmr.msra.gmra.mxu2 %vm1331_vm11, %v2556_v53  ;;  %vm1006_vm1 = vcmp.lt.s32.totalorder %v1005_v6, 2  ;;  %vm1007_vm14 = vcmp.eq.s32.totalorder %v1005_v6, 0  ;;  %vm1010_vm2 = vcmp.eq.s32.totalorder %v1005_v6, 2  ;;  %vm388_vm15 = vcmp.lt.s32.totalorder %v387_v39, 2  ;;  %1478 = vperm.xlu2 %1914, %v1472_v58   ;;  %v1519_v6 = vld [vmem:[%s2714_s6 + $0x18] sm:$0xff] }
 0x126   :  { %v355_v44 = vor.u32 %v354_v24, %v353_v34  ;;  %v358_v54 = vshll.u32 %v357_v26, 23  ;;  %vm389_vm0 = vcmp.eq.s32.totalorder %v387_v39, 0  ;;  %vm392_vm3 = vcmp.eq.s32.totalorder %v387_v39, 2  ;;  %1537 = vperm.xlu0 %1916, %v1519_v6  }
 0x127   :  { %1522 = vperm.xlu1 %1915, %v1516_v25  }
 0x128   :  { %v359_v43 = vor.u32 4788187, %v358_v54  ;;  %v362_v55 = vcvt.s32.f32 %v355_v44 }
 0x12a   :  { %v360_v37 = vand.u32 2147483647, %v359_v43 }
 0x12c   :  { %v363_v3 = vmul.f32 %v362_v55, %v360_v37  ;;  %1866 = vmatmul.msk.f32.gmra.mxu0 %vm1331_vm11, %v2580_v45 }
 0x12d   :  { %1874 = vmatmul.msk.f32.gmra.mxu2 %vm1331_vm11, %v2575_v29 }
 0x12e   :  { %v364_v46 = vxor.u32 2147483648, %v363_v3  ;;  %1639 = vperm.xlu0 %1916, %v1625_v41  }
 0x12f   :  { %1634 = vperm.xlu1 %1915, %v1624_v47  }
 0x130   :  { %v365_v62 = vsel %vm244_vm12, %v364_v46, %v363_v3 }
 0x131   :  { %v368_v0 = vsel %vm243_vm13, %v2089_v28, %v365_v62  ;;  %v1517_v28 = vld [vmem:[%s2714_s6 + $0x8] sm:$0xff]  ;;  %vm1817_vm13 = vcmask 1040384  }
 0x132   :  { %v370_v1 = vmul.f32 %v368_v0, %v368_v0  ;;  %1527 = vperm.xlu2 %1914, %v1517_v28  }
 0x134   :  { %v371_v52 = vmul.f32 -0.001358992, %v370_v1  ;;  %v378_v8 = vmul.f32 -0.00019511016, %v370_v1  ;;  %1867 = vmatmul.msk.f32.gmra.mxu0 %vm1331_vm11, %v1329_v61 }
 0x135   :  { %1875 = vmatmul.msk.f32.gmra.mxu2 %vm1331_vm11, %v1325_v60 }
 0x136   :  { %v372_v4 = vadd.f32 0.041655596, %v371_v52  ;;  %v379_v57 = vadd.f32 0.008332121, %v378_v8 }
 0x138   :  { %v373_v22 = vmul.f32 %v372_v4, %v370_v1  ;;  %v380_v30 = vmul.f32 %v379_v57, %v370_v1 }
 0x13a   :  { %v374_v63 = vadd.f32 -0.4999988, %v373_v22  ;;  %v381_v50 = vadd.f32 -0.16666654, %v380_v30  ;;  %1644 = vperm.xlu2 %1914, %v1626_v42  }
 0x13c   :  { %v375_v51 = vmul.f32 %v374_v63, %v370_v1  ;;  %v382_v32 = vmul.f32 %v381_v50, %v370_v1  ;;  %1868 = vmatmul.msk.f32.gmra.mxu0 %vm1331_vm11, %v1330_v17 }
 0x13d   :  { %1876 = vmatmul.msk.f32.gmra.mxu2 %vm1331_vm11, %v1326_v7 }
 0x13e   :  { %v376_v27 = vadd.f32 1.0, %v375_v51  ;;  %v383_v2 = vadd.f32 1.0, %v382_v32 }
 0x140   :  { %v384_v40 = vmul.f32 %v383_v2, %v368_v0  ;;  %v393_v36 = vxor.u32 2147483648, %v376_v27  ;;  %v1514_v2 = vld [vmem:[%s2713_s5 + $0x10] sm:$0xff] }
 0x142   :  { %v390_v10 = vxor.u32 2147483648, %v384_v40  ;;  %v1012_v5 = vsel %vm1010_vm2, %v393_v36, %v384_v40  ;;  %v394_v11 = vsel %vm392_vm3, %v393_v36, %v384_v40  ;;  %1629 = vperm.xlu2 %1914, %v1623_v33   ;;  %v1515_v36 = vld [vmem:[%s2713_s5 + $0x18] sm:$0xff] }
 0x144   :  { %v1009_v38 = vsel %vm1007_vm14, %v376_v27, %v390_v10  ;;  %v391_v14 = vsel %vm389_vm0, %v376_v27, %v390_v10 }
 0x145   :  { %v1013_v15 = vsel %vm1006_vm1, %v1009_v38, %v1012_v5  ;;  %v395_v35 = vsel %vm388_vm15, %v391_v14, %v394_v11  ;;  %v1726_v38 = vld [vmem:[#allocation2] sm:$0x1] }
 0x146   :  { %v1014_v9 = vsel %vm385_vm4, nan, %v1013_v15  ;;  %v396_v18 = vsel %vm385_vm4, nan, %v395_v35  ;;  %1729 = vperm.xlu0 %1916, %v1726_v38  }
 0x147   :  { %1388 = vmatpush.msra.mxu1 %v1014_v9  ;;  %1458 = vmatpush.msra.mxu3 %v396_v18 }
 0x148   :  { %1877 = vmatmul.msk.f32.vlgmr.msra.gmra.mxu3 %vm1331_vm11, %v2556_v53  ;;  %1869 = vmatmul.msk.f32.vlgmr.msra.gmra.mxu1 %vm1331_vm11, %v2561_v56 }
 0x150   :  { %1878 = vmatmul.msk.f32.gmra.mxu3 %vm1331_vm11, %v2575_v29  ;;  %1870 = vmatmul.msk.f32.gmra.mxu1 %vm1331_vm11, %v2580_v45 }
 0x158   :  { %1879 = vmatmul.msk.f32.gmra.mxu3 %vm1331_vm11, %v1325_v60  ;;  %1871 = vmatmul.msk.f32.gmra.mxu1 %vm1331_vm11, %v1329_v61  ;;  %v1512_v60 = vld [vmem:[%s2713_s5] sm:$0xff] }
 0x160   :  { %1880 = vmatmul.msk.f32.gmra.mxu3 %vm1331_vm11, %v1326_v7  ;;  %1872 = vmatmul.msk.f32.gmra.mxu1 %vm1331_vm11, %v1330_v17 }
 0x16e   :  { %v1494_v54 = vpop.permute.xlu2 %1493 }
 0x176   :  { %v1489_v43 = vpop.permute.xlu2 %1488 }
 0x17f   :  { %v1479_v0 = vpop.permute.xlu2 %1478 }
 0x189   :  { %v1484_v29 = vpop.permute.xlu1 %1483 }
 0x18c   :  { %v1528_v25 = vpop.permute.xlu2 %1527 }
 0x191   :  { %v1533_v15 = vpop.permute.xlu1 %1532 }
 0x198   :  { %v1538_v35 = vpop.permute.xlu0 %1537 }
 0x199   :  { %v1523_v47 = vpop.permute.xlu1 %1522 }
 0x1a1   :  { %v1361_v34 = vpop.f32.mrf.mxu0 }
 0x1a8   :  { %v1431_v24 = vpop.f32.mrf.mxu2 }
 0x1a9   :  { %v1364_v26 = vpop.f32.mrf.mxu0  ;;  %v1432_v3 = vadd.f32 %v1431_v24, %v1361_v34 }
 0x1ab   :  { %v1496_v1 = vadd.f32 %v1479_v0, %v1432_v3 }
 0x1b0   :  { %v1434_v44 = vpop.f32.mrf.mxu2 }
 0x1b1   :  { %v1367_v31 = vpop.f32.mrf.mxu0  ;;  %v1435_v37 = vadd.f32 %v1434_v44, %v1364_v26 }
 0x1b3   :  { %v1498_v20 = vadd.f32 %v1484_v29, %v1435_v37 }
 0x1b8   :  { %v1437_v48 = vpop.f32.mrf.mxu2 }
 0x1b9   :  { %v1370_v12 = vpop.f32.mrf.mxu0  ;;  %v1438_v56 = vadd.f32 %v1437_v48, %v1367_v31 }
 0x1bb   :  { %v1500_v46 = vadd.f32 %v1489_v43, %v1438_v56 }
 0x1c0   :  { %v1440_v21 = vpop.f32.mrf.mxu2 }
 0x1c1   :  { %v1441_v55 = vadd.f32 %v1440_v21, %v1370_v12  ;;  %v1621_v21 = vld [vmem:[%s2715_s7 + $0x10] sm:$0xff] }
 0x1c3   :  { %v1502_v62 = vadd.f32 %v1494_v54, %v1441_v55 }
 0x1c5   :  { %v1390_v53 = vpop.f32.mrf.mxu1  ;;  %1917 = vtanh.f32 %v1502_v62 }
 0x1c6   :  { %1919 = vtanh.f32 %v1500_v46  ;;  %v1622_v46 = vld [vmem:[%s2715_s7 + $0x18] sm:$0xff] }
 0x1c7   :  { %1921 = vtanh.f32 %v1498_v20 }
 0x1c8   :  { %1923 = vtanh.f32 %v1496_v1 }
 0x1cb   :  { %v1460_v45 = vpop.f32.mrf.mxu3  ;;  %v1918_v8 = vpop.eup %1917 }
 0x1cc   :  { %1565 = vmatpush.msrb.mxu0 %v1918_v8  ;;  %v1920_v19 = vpop.eup %1919  ;;  %v1461_v51 = vadd.f32 %v1460_v45, %v1390_v53  ;;  %v1640_v8 = vpop.permute.xlu0 %1639 }
 0x1cd   :  { %v1393_v52 = vpop.f32.mrf.mxu1  ;;  %v1922_v57 = vpop.eup %1921 }
 0x1ce   :  { %1566 = vmatpush.msrb.mxu0 %v1920_v19  ;;  %v1924_v16 = vpop.eup %1923  ;;  %v1497_v7 = vadd.f32 %v1479_v0, %v1461_v51 }
 0x1d0   :  { %1567 = vmatpush.msrb.mxu0 %v1922_v57 }
 0x1d2   :  { %1568 = vmatpush.msrb.mxu0 %v1924_v16 }
 0x1d3   :  { %v1463_v4 = vpop.f32.mrf.mxu3  ;;  %1881 = vmatmul.msk.f32.vlgmr.msrb.gmra.mxu0 %vm1540_vm5, %v1512_v60 }
 0x1d4   :  { %v1464_v50 = vadd.f32 %v1463_v4, %v1393_v52  ;;  %v1645_v52 = vpop.permute.xlu2 %1644 }
 0x1d5   :  { %v1396_v22 = vpop.f32.mrf.mxu1 }
 0x1d6   :  { %v1499_v39 = vadd.f32 %v1484_v29, %v1464_v50 }
 0x1db   :  { %v1466_v30 = vpop.f32.mrf.mxu3  ;;  %1882 = vmatmul.msk.f32.gmra.mxu0 %vm1540_vm5, %v1513_v49 }
 0x1dc   :  { %v1467_v59 = vadd.f32 %v1466_v30, %v1396_v22  ;;  %v1630_v22 = vpop.permute.xlu2 %1629 }
 0x1dd   :  { %v1399_v61 = vpop.f32.mrf.mxu1 }
 0x1de   :  { %v1501_v32 = vadd.f32 %v1489_v43, %v1467_v59  ;;  %v1620_v43 = vld [vmem:[%s2715_s7 + $0x8] sm:$0xff] }
 0x1e3   :  { %v1469_v63 = vpop.f32.mrf.mxu3  ;;  %1883 = vmatmul.msk.f32.gmra.mxu0 %vm1540_vm5, %v1514_v2 }
 0x1e4   :  { %v1470_v13 = vadd.f32 %v1469_v63, %v1399_v61 }
 0x1e6   :  { %v1503_v27 = vadd.f32 %v1494_v54, %v1470_v13  ;;  %v1619_v54 = vld [vmem:[%s2715_s7] sm:$0xff] }
 0x1e7   :  { %v1725_v13 = vld [vmem:[%s2717_s9] sm:$0x1]  ;;  %s2007_s9 = smov [#allocation3]  }
 0x1e8   :  { %1925 = vtanh.f32 %v1503_v27  ;;  %s1830_s27 = sshll.u32 %s2007_s9, 4  ;;  %s1831_s27 = int_to_ptr.vmem [resolvable:$true] %s1830_s27 }
 0x1e9   :  { %1927 = vtanh.f32 %v1501_v32 }
 0x1ea   :  { %1929 = vtanh.f32 %v1499_v39 }
 0x1eb   :  { %1931 = vtanh.f32 %v1497_v7  ;;  %1884 = vmatmul.msk.f32.gmra.mxu0 %vm1540_vm5, %v1515_v36 }
 0x1ee   :  { %v1926_v40 = vpop.eup %1925 }
 0x1ef   :  { %1594 = vmatpush.msrb.mxu1 %v1926_v40  ;;  %v1928_v17 = vpop.eup %1927 }
 0x1f0   :  { %v1930_v23 = vpop.eup %1929 }
 0x1f1   :  { %1595 = vmatpush.msrb.mxu1 %v1928_v17  ;;  %v1932_v10 = vpop.eup %1931 }
 0x1f3   :  { %1596 = vmatpush.msrb.mxu1 %v1930_v23  ;;  %v1730_v23 = vpop.permute.xlu0 %1729 }
 0x1f4   :  { %v1732_v38 = vperm.slane %v1730_v23, 0 }
 0x1f5   :  { %1597 = vmatpush.msrb.mxu1 %v1932_v10 }
 0x1f6   :  { %1885 = vmatmul.msk.f32.vlgmr.msrb.gmra.mxu1 %vm1540_vm5, %v1512_v60  ;;  %v1635_v60 = vpop.permute.xlu1 %1634 }
 0x1fe   :  { %1886 = vmatmul.msk.f32.gmra.mxu1 %vm1540_vm5, %v1513_v49 }
 0x206   :  { %1887 = vmatmul.msk.f32.gmra.mxu1 %vm1540_vm5, %v1514_v2 }
 0x20e   :  { %1888 = vmatmul.msk.f32.gmra.mxu1 %vm1540_vm5, %v1515_v36 }
 0x250   :  { %v1570_v5 = vpop.f32.mrf.mxu0 }
 0x251   :  { %v1571_v42 = vadd.f32 %v1570_v5, %v1523_v47 }
 0x258   :  { %v1573_v14 = vpop.f32.mrf.mxu0 }
 0x259   :  { %v1574_v28 = vadd.f32 %v1573_v14, %v1528_v25 }
 0x260   :  { %v1576_v11 = vpop.f32.mrf.mxu0 }
 0x261   :  { %v1577_v18 = vadd.f32 %v1576_v11, %v1533_v15 }
 0x268   :  { %v1579_v9 = vpop.f32.mrf.mxu0 }
 0x269   :  { %v1580_v58 = vadd.f32 %v1579_v9, %v1538_v35 }
 0x26b   :  { %1933 = vtanh.f32 %v1580_v58 }
 0x26c   :  { %1935 = vtanh.f32 %v1577_v18 }
 0x26d   :  { %1937 = vtanh.f32 %v1574_v28 }
 0x26e   :  { %1939 = vtanh.f32 %v1571_v42 }
 0x271   :  { %v1934_v34 = vpop.eup %1933 }
 0x272   :  { %1671 = vmatpush.msrb.mxu2 %v1934_v34  ;;  %v1936_v24 = vpop.eup %1935 }
 0x273   :  { %v1599_v33 = vpop.f32.mrf.mxu1  ;;  %v1938_v26 = vpop.eup %1937 }
 0x274   :  { %1672 = vmatpush.msrb.mxu2 %v1936_v24  ;;  %v1940_v31 = vpop.eup %1939  ;;  %v1600_v55 = vadd.f32 %v1599_v33, %v1523_v47 }
 0x276   :  { %1673 = vmatpush.msrb.mxu2 %v1938_v26 }
 0x278   :  { %1674 = vmatpush.msrb.mxu2 %v1940_v31 }
 0x279   :  { %1889 = vmatmul.msk.f32.vlgmr.msrb.gmra.mxu2 %vm1540_vm5, %v1619_v54 }
 0x27b   :  { %v1602_v44 = vpop.f32.mrf.mxu1 }
 0x27c   :  { %v1603_v37 = vadd.f32 %v1602_v44, %v1528_v25 }
 0x281   :  { %1890 = vmatmul.msk.f32.gmra.mxu2 %vm1540_vm5, %v1620_v43 }
 0x283   :  { %v1605_v48 = vpop.f32.mrf.mxu1 }
 0x284   :  { %v1606_v53 = vadd.f32 %v1605_v48, %v1533_v15 }
 0x289   :  { %1891 = vmatmul.msk.f32.gmra.mxu2 %vm1540_vm5, %v1621_v21 }
 0x28b   :  { %v1608_v12 = vpop.f32.mrf.mxu1 }
 0x28c   :  { %v1609_v56 = vadd.f32 %v1608_v12, %v1538_v35 }
 0x28e   :  { %1941 = vtanh.f32 %v1609_v56 }
 0x28f   :  { %1943 = vtanh.f32 %v1606_v53 }
 0x290   :  { %1945 = vtanh.f32 %v1603_v37 }
 0x291   :  { %1947 = vtanh.f32 %v1600_v55  ;;  %1892 = vmatmul.msk.f32.gmra.mxu2 %vm1540_vm5, %v1622_v46 }
 0x294   :  { %v1942_v3 = vpop.eup %1941 }
 0x295   :  { %1700 = vmatpush.msrb.mxu3 %v1942_v3  ;;  %v1944_v62 = vpop.eup %1943 }
 0x296   :  { %v1946_v29 = vpop.eup %1945 }
 0x297   :  { %1701 = vmatpush.msrb.mxu3 %v1944_v62  ;;  %v1948_v45 = vpop.eup %1947 }
 0x299   :  { %1702 = vmatpush.msrb.mxu3 %v1946_v29 }
 0x29b   :  { %1703 = vmatpush.msrb.mxu3 %v1948_v45 }
 0x29c   :  { %1893 = vmatmul.msk.f32.vlgmr.msrb.gmra.mxu3 %vm1540_vm5, %v1619_v54 }
 0x2a4   :  { %1894 = vmatmul.msk.f32.gmra.mxu3 %vm1540_vm5, %v1620_v43 }
 0x2ac   :  { %1895 = vmatmul.msk.f32.gmra.mxu3 %vm1540_vm5, %v1621_v21  ;;  %v1820_v21 = vlaneseq }
 0x2ae   :  { %vm1822_vm14 = vcmp.lt.s32.totalorder %v1820_v21, 256 }
 0x2b4   :  { %1896 = vmatmul.msk.f32.gmra.mxu3 %vm1540_vm5, %v1622_v46 }
 0x2fc   :  { %v1676_v20 = vpop.f32.mrf.mxu2 }
 0x2fd   :  { %v1677_v30 = vadd.f32 %v1676_v20, %v1630_v22 }
 0x304   :  { %v1679_v0 = vpop.f32.mrf.mxu2 }
 0x305   :  { %v1680_v16 = vadd.f32 %v1679_v0, %v1635_v60 }
 0x30c   :  { %v1682_v1 = vpop.f32.mrf.mxu2 }
 0x30d   :  { %v1683_v4 = vadd.f32 %v1682_v1, %v1640_v8 }
 0x314   :  { %v1685_v19 = vpop.f32.mrf.mxu2 }
 0x315   :  { %v1686_v57 = vadd.f32 %v1685_v19, %v1645_v52 }
 0x317   :  { %1949 = vtanh.f32 %v1686_v57 }
 0x318   :  { %1951 = vtanh.f32 %v1683_v4 }
 0x319   :  { %1953 = vtanh.f32 %v1680_v16 }
 0x31a   :  { %1955 = vtanh.f32 %v1677_v30 }
 0x31d   :  { %v1950_v61 = vpop.eup %1949 }
 0x31e   :  { %1748 = vmatpush.msra.mxu0 %v1950_v61  ;;  %v1952_v59 = vpop.eup %1951 }
 0x31f   :  { %v1705_v49 = vpop.f32.mrf.mxu3  ;;  %v1954_v63 = vpop.eup %1953 }
 0x320   :  { %1749 = vmatpush.msra.mxu0 %v1952_v59  ;;  %v1956_v51 = vpop.eup %1955  ;;  %v1706_v7 = vadd.f32 %v1705_v49, %v1630_v22 }
 0x322   :  { %1750 = vmatpush.msra.mxu0 %v1954_v63 }
 0x324   :  { %1751 = vmatpush.msra.mxu0 %v1956_v51 }
 0x325   :  { %1897 = vmatmul.msk.f32.vlgmr.msra.gmra.mxu0 %vm1540_vm5, %v1725_v13 }
 0x327   :  { %v1708_v50 = vpop.f32.mrf.mxu3 }
 0x328   :  { %v1709_v39 = vadd.f32 %v1708_v50, %v1635_v60 }
 0x32f   :  { %v1711_v32 = vpop.f32.mrf.mxu3 }
 0x330   :  { %v1712_v2 = vadd.f32 %v1711_v32, %v1640_v8 }
 0x337   :  { %v1714_v27 = vpop.f32.mrf.mxu3 }
 0x338   :  { %v1715_v6 = vadd.f32 %v1714_v27, %v1645_v52 }
 0x33a   :  { %1957 = vtanh.f32 %v1715_v6 }
 0x33b   :  { %1959 = vtanh.f32 %v1712_v2 }
 0x33c   :  { %1961 = vtanh.f32 %v1709_v39 }
 0x33d   :  { %1963 = vtanh.f32 %v1706_v7 }
 0x340   :  { %v1958_v40 = vpop.eup %1957 }
 0x341   :  { %1768 = vmatpush.msra.mxu1 %v1958_v40  ;;  %v1960_v36 = vpop.eup %1959 }
 0x342   :  { %v1962_v41 = vpop.eup %1961 }
 0x343   :  { %1769 = vmatpush.msra.mxu1 %v1960_v36  ;;  %v1964_v17 = vpop.eup %1963 }
 0x345   :  { %1770 = vmatpush.msra.mxu1 %v1962_v41 }
 0x347   :  { %1771 = vmatpush.msra.mxu1 %v1964_v17 }
 0x348   :  { %1898 = vmatmul.msk.f32.vlgmr.msra.gmra.mxu1 %vm1540_vm5, %v1725_v13 }
 0x3a2   :  { %v1753_v10 = vpop.f32.mrf.mxu0 }
 0x3a3   :  { %v1754_v5 = vadd.f32 %v1753_v10, %v1732_v38 }
 0x3a5   :  { %v1899_v14 = vmul.f32 -1.442695, %v1754_v5 }
 0x3a7   :  { %1965 = vpow2.f32 %v1899_v14 }
 0x3ad   :  { %v1966_v11 = vpop.eup %1965 }
 0x3ae   :  { %v1782_v15 = vadd.f32 1.0, %v1966_v11 }
 0x3b0   :  { %1967 = vrcp.f32 %v1782_v15  ;;  %vm1789_vm8 = vweird.f32 %v1782_v15  ;;  %v1795_v43 = vand.u32 2147483648, %v1782_v15  ;;  %v1793_v53 = vand.u32 2147483647, %v1782_v15 }
 0x3b2   :  { %v1796_v46 = vor.u32 1.1754944e-38, %v1795_v43  ;;  %vm1794_vm1 = vcmp.eq.f32.partialorder %v1793_v53, 8.507059e+37 }
 0x3b6   :  { %v1968_v58 = vpop.eup %1967 }
 0x3b7   :  { %v1785_v47 = vmul.f32 %v1968_v58, %v1782_v15  ;;  %vm1790_vm6 = vweird.f32 %v1968_v58 }
 0x3b8   :  { %vm2699_vm9 = vmor %vm1789_vm8, %vm1790_vm6 }
 0x3b9   :  { %v1786_v42 = vsub.f32 1.0, %v1785_v47 }
 0x3bb   :  { %v1787_v24 = vmul.f32 %v1968_v58, %v1786_v42 }
 0x3bd   :  { %v1788_v54 = vadd.f32 %v1968_v58, %v1787_v24 }
 0x3bf   :  { %v1792_v55 = vsel %vm2699_vm9, %v1968_v58, %v1788_v54 }
 0x3c0   :  { %v1797_v45 = vsel %vm1794_vm1, %v1796_v46, %v1792_v55 }
 0x3c5   :  { %v1773_v35 = vpop.f32.mrf.mxu1 }
 0x3c6   :  { %v1774_v9 = vadd.f32 %v1773_v35, %v1732_v38 }
 0x3c8   :  { %v1900_v18 = vmul.f32 -1.442695, %v1774_v9 }
 0x3ca   :  { %1969 = vpow2.f32 %v1900_v18 }
 0x3d0   :  { %v1970_v25 = vpop.eup %1969 }
 0x3d1   :  { %v1783_v28 = vadd.f32 1.0, %v1970_v25 }
 0x3d3   :  { %1971 = vrcp.f32 %v1783_v28  ;;  %v1810_v44 = vand.u32 2147483648, %v1783_v28  ;;  %v1808_v48 = vand.u32 2147483647, %v1783_v28  ;;  %vm1804_vm10 = vweird.f32 %v1783_v28 }
 0x3d5   :  { %v1811_v37 = vor.u32 1.1754944e-38, %v1810_v44  ;;  %vm1809_vm12 = vcmp.eq.f32.partialorder %v1808_v48, 8.507059e+37 }
 0x3d9   :  { %v1972_v33 = vpop.eup %1971 }
 0x3da   :  { %v1800_v34 = vmul.f32 %v1972_v33, %v1783_v28  ;;  %vm1805_vm7 = vweird.f32 %v1972_v33 }
 0x3db   :  { %vm1806_vm11 = vmor %vm1804_vm10, %vm1805_vm7 }
 0x3dc   :  { %v1801_v26 = vsub.f32 1.0, %v1800_v34 }
 0x3de   :  { %v1802_v31 = vmul.f32 %v1972_v33, %v1801_v26 }
 0x3e0   :  { %v1803_v56 = vadd.f32 %v1972_v33, %v1802_v31 }
 0x3e2   :  { %v1807_v3 = vsel %vm1806_vm11, %v1972_v33, %v1803_v56 }
 0x3e3   :  { %v1812_v62 = vsel %vm1809_vm12, %v1811_v37, %v1807_v3 }
 0x3e4   :  { %v1816_v29 = vrot.slane %v1812_v62, 7 }
 0x3e6   :  { %v1818_v20 = vsel %vm1817_vm13, %v1797_v45, %v1816_v29 }
 0x3e7   :  { %1824 = vst.msk [vmem:[#allocation3] sm:$0x3] %vm1822_vm14, %v1818_v20 }
 0x3e8   :  { %1835 = dma.vmem_to_hbm [thread:$0]  %s1831_s27, 32, %s1833_s29, [#allocation4]  }
 0x3e9   :  { %1997 = dma.done.wait [#allocation4], 32  }
 0x3ea   :  { %1998 = vsyncadd [#allocation4], 4294967264 }
 0x3eb   :  { %1840 = vsyncpa [#allocation4], 1 }

</bundles_post_ra>
